<compile_context>
chip_gen: v7x
topology: tpu7x:2x2x1
jax: 0.10.0
libtpu: 0.0.40
codegen_flags: <defaults>
</compile_context>

<pallas_src>
import functools

import jax
import jax.numpy as jnp
from jax.experimental import pallas as pl
from jax.experimental.pallas import tpu as pltpu


def _act_quant_kernel(x_ref, o_ref, *, a_bit: int):
    # Load in native dtype, compute in f32, store back in native dtype.
    x = x_ref[...].astype(jnp.float32)
    if a_bit == 1:
        # torch: sign(clamp(x, 0, 1)) -> 1.0 for x > 0, 0.0 otherwise.
        q = jnp.where(x > 0.0, 1.0, 0.0)
    else:
        n = float(2 ** a_bit - 1)
        q = jnp.round(jnp.clip(x, 0.0, 1.0) * n) * (1.0 / n)
    o_ref[...] = q.astype(o_ref.dtype)


def activation_quantize(x, a_bit: int):
    """Equivalent of activation_quantize_fn(a_bit).forward(x) (forward pass only)."""
    assert a_bit <= 8 or a_bit == 32
    if a_bit == 32:
        # Pass-through: avoid a pointless full HBM read+write.
        return x

    orig_shape = x.shape
    orig_dtype = x.dtype
    total = int(x.size)
    if total == 0:
        return x

    LANE = 128
    padded = -(-total // LANE) * LANE  # round up to a lane multiple
    # Widest lane-dense last dim that divides the (padded) flat length.
    for W in (4096, 2048, 1024, 512, 256, 128):
        if padded % W == 0:
            break
    rows = padded // W

    x_flat = x.reshape(-1)
    needs_pad = padded != total
    if needs_pad:
        # TODO(synk): rare fallback when numel % 128 != 0; costs one extra pad + slice pass.
        x_flat = jnp.pad(x_flat, (0, padded - total))
    x2d = x_flat.reshape(rows, W)

    # ~1 MiB blocks in the storage dtype: large enough to hit the HBM roofline,
    # small enough that (2 in-bufs + 2 out-bufs) stays far under scoped VMEM limits
    # on all of v5e / v6e / v7x.
    itemsize = jnp.dtype(orig_dtype).itemsize
    target_bytes = 1 << 20
    br = max(1, target_bytes // (W * itemsize))
    br = min(br, rows)
    if rows >= 8:
        br = max(8, (br // 8) * 8)  # keep block rows a multiple of 8
    else:
        br = rows                   # block equals full rows dim for tiny inputs
    grid = (pl.cdiv(rows, br),)     # edge block (if any) is masked by Pallas

    out2d = pl.pallas_call(
        functools.partial(_act_quant_kernel, a_bit=a_bit),
        out_shape=jax.ShapeDtypeStruct((rows, W), orig_dtype),
        grid_spec=pltpu.PrefetchScalarGridSpec(
            num_scalar_prefetch=0,
            grid=grid,
            in_specs=[pl.BlockSpec((br, W), lambda i: (i, 0))],
            out_specs=pl.BlockSpec((br, W), lambda i: (i, 0)),
        ),
        compiler_params=pltpu.CompilerParams(
            dimension_semantics=("parallel",),  # shards the grid across v7x's 2 TCs
        ),
    )(x2d)

    out_flat = out2d.reshape(-1)
    if needs_pad:
        out_flat = out_flat[:total]
    return out_flat.reshape(orig_shape)


if __name__ == "__main__":
    key = jax.random.PRNGKey(0)
    # NCHW activations, small shapes.
    x_f32 = jax.random.normal(key, (2, 4, 16, 16), dtype=jnp.float32)
    x_bf16 = x_f32.astype(jnp.bfloat16)

    # Pure-JAX reference mirroring the torch forward.
    def ref(x, a_bit):
        if a_bit == 32:
            return x
        xf = x.astype(jnp.float32)
        xc = jnp.clip(xf, 0.0, 1.0)
        if a_bit == 1:
            out = jnp.sign(xc)
        else:
            n = float(2 ** a_bit - 1)
            out = jnp.round(xc * n) / n
        return out.astype(x.dtype)

    ok = True
    for a_bit in (1, 4, 8, 32):
        y = jax.block_until_ready(activation_quantize(x_f32, a_bit))
        r = ref(x_f32, a_bit)
        if not jnp.allclose(y, r, atol=1e-6):
            ok = False
        # Native-dtype I/O path (bf16 in HBM, f32 math inside the kernel).
        yb = jax.block_until_ready(activation_quantize(x_bf16, a_bit))
        rb = ref(x_bf16, a_bit)
        if yb.dtype != jnp.bfloat16 or not jnp.allclose(
            yb.astype(jnp.float32), rb.astype(jnp.float32), atol=1e-2
        ):
            ok = False

    if ok:
        print("KERNEL_OK")
</pallas_src>

<mosaic_0001>
module attributes {stable_mosaic.version = 11 : i64} {
  func.func @_act_quant_kernel(%arg0: i32, %arg1: memref<1x2048xf32, #tpu.memory_space<vmem>>, %arg2: memref<1x2048xf32, #tpu.memory_space<vmem>>) attributes {dimension_semantics = [#tpu.dimension_semantics<parallel>], iteration_bounds = array<i64: 1>, scalar_prefetch = 0 : i64, scratch_operands = 0 : i64, tpu.core_type = #tpu.core_type<tc>, window_params = [{transform_indices = @transform_0, window_bounds = array<i64: 1, 2048>}, {transform_indices = @transform_1, window_bounds = array<i64: 1, 2048>}]} {
    %c0 = arith.constant 0 : index
    %c0_0 = arith.constant 0 : index
    %0 = vector.load %arg1[%c0, %c0_0] : memref<1x2048xf32, #tpu.memory_space<vmem>>, vector<1x2048xf32>
    %cst = arith.constant 0.000000e+00 : f32
    %1 = vector.broadcast %cst : f32 to vector<1x2048xf32>
    %2 = arith.cmpf ogt, %0, %1 : vector<1x2048xf32>
    %cst_1 = arith.constant 1.000000e+00 : f32
    %cst_2 = arith.constant 0.000000e+00 : f32
    %3 = vector.broadcast %cst_1 : f32 to vector<1x2048xf32>
    %4 = vector.broadcast %cst_2 : f32 to vector<1x2048xf32>
    %5 = arith.select %2, %3, %4 : vector<1x2048xi1>, vector<1x2048xf32>
    %c0_3 = arith.constant 0 : index
    %c0_4 = arith.constant 0 : index
    %6 = vector.load %arg2[%c0_3, %c0_4] : memref<1x2048xf32, #tpu.memory_space<vmem>>, vector<1x2048xf32>
    tpu.vector_store %arg2[%c0_3, %c0_4], %5 {strides = array<i32>} : memref<1x2048xf32, #tpu.memory_space<vmem>>, vector<1x2048xf32>,
    return
  }
  func.func @transform_0(%arg0: i32) -> (i32, i32) {
    %c0_i32 = arith.constant 0 : i32
    %c0_i32_0 = arith.constant 0 : i32
    return %arg0, %c0_i32 : i32, i32
  }
  func.func @transform_1(%arg0: i32) -> (i32, i32) {
    %c0_i32 = arith.constant 0 : i32
    %c0_i32_0 = arith.constant 0 : i32
    return %arg0, %c0_i32 : i32, i32
  }
}

</mosaic_0001>

<bundles_post_ra>
// kernel: tpu_custom_call.1
= control target key start
LH: loop header
LB: loop body
LE: loop exit
PB: predicated region body
PF: predicated region fallthrough
CT: control target
= control target key end

     0   :  { %6 = vsyncpa [#allocation3], 0  ;;  %s132_s0 = inlined_call_operand.hbm [shape: f32[1,2048], index: 0, kind: input, shape index: {}]   ;;  %s133_s1 = inlined_call_operand.hbm [shape: f32[1,2048], index: 1, kind: output, shape index: {}]  }
   0x1   :  { %7 = vsyncpa [#allocation4], 0  ;;  %s95_s6 = smov [#allocation2]   ;;  %s47_s10 = scalar_lea.hbm %s132_s0, 256 }
   0x2   :  { %s14_s7 = sshll.u32 %s95_s6, 4  ;;  %p48_p0 = scmp.ne.s32.totalorder %s132_s0, %s47_s10  ;;  %s15_s7 = int_to_ptr.vmem [resolvable:$true] %s14_s7 }
   0x3   :  { %p51_p1 = scmp.lt.u32.totalorder %s47_s10, %s132_s0 }
   0x5   :  { %p53_p2 = pnand %p51_p1, %p48_p0 }
   0x7   :  { %56 = shalt.err (!%p53_p2)
}
   0x8   :  { %s57_s15 = scalar_lea.vmem %s15_s7, 256  ;;  %p62_p4 = scmp.lt.s32.totalorder %s15_s7, %s15_s7 }
   0x9   :  { %p58_p3 = scmp.ne.s32.totalorder %s15_s7, %s57_s15  ;;  %p63_p5 = scmp.lt.s32.totalorder %s57_s15, %s57_s15 }
   0xb   :  { %p64_p6 = por %p63_p5, %p62_p4 }
   0xd   :  { %p65_p7 = pnand %p64_p6, %p58_p3 }
   0xf   :  { %68 = shalt.err (!%p65_p7)
}
  0x10   :  { %17 = dma.hbm_to_vmem [thread:$0]  %s132_s0, 256, %s15_s7, [#allocation3]  }
  0x11   :  { %91 = dma.done.wait [#allocation3], 256  }
  0x12   :  { %92 = vsyncadd [#allocation3], 4294967040  ;;  %s96_s18 = smov [#allocation5]   ;;  %v21_v0 = vld [vmem:[#allocation2] sm:$0xff]  ;;  %v22_v1 = vld [vmem:[#allocation2 + $0x8] sm:$0xff]  ;;  %v97_v2 = vmov 0.0  }
  0x13   :  { %s35_s19 = sshll.u32 %s96_s18, 4  ;;  %vm23_vm0 = vcmp.gt.f32.partialorder %v21_v0, 0.0  ;;  %vm24_vm1 = vcmp.gt.f32.partialorder %v22_v1, 0.0  ;;  %s36_s19 = int_to_ptr.vmem [resolvable:$true] %s35_s19 }
  0x14   :  { %v25_v3 = vsel %vm23_vm0, 1.0, %v97_v2  ;;  %v26_v4 = vsel %vm24_vm1, 1.0, %v97_v2  ;;  %s69_s20 = scalar_lea.vmem %s36_s19, 256  ;;  %p74_p9 = scmp.lt.s32.totalorder %s36_s19, %s36_s19 }
  0x15   :  { %27 = vst [vmem:[#allocation5] sm:$0xff] %v25_v3  ;;  %28 = vst [vmem:[#allocation5 + $0x8] sm:$0xff] %v26_v4  ;;  %p70_p8 = scmp.ne.s32.totalorder %s36_s19, %s69_s20  ;;  %p75_p10 = scmp.lt.s32.totalorder %s69_s20, %s69_s20 }
  0x17   :  { %p76_p11 = por %p75_p10, %p74_p9 }
  0x19   :  { %p77_p12 = pnand %p76_p11, %p70_p8 }
  0x1b   :  { %80 = shalt.err (!%p77_p12)
}
  0x1c   :  { %s81_s22 = scalar_lea.hbm %s133_s1, 256 }
  0x1d   :  { %p82_p13 = scmp.ne.s32.totalorder %s133_s1, %s81_s22  ;;  %p85_p0 = scmp.lt.u32.totalorder %s81_s22, %s133_s1 }
  0x1f   :  { %p87_p1 = pnand %p85_p0, %p82_p13 }
  0x21   :  { %90 = shalt.err (!%p87_p1)
}
  0x22   :  { %38 = dma.vmem_to_hbm [thread:$0]  %s36_s19, 256, %s133_s1, [#allocation4]  }
  0x23   :  { %93 = dma.done.wait [#allocation4], 256  }
  0x24   :  { %94 = vsyncadd [#allocation4], 4294967040 }
  0x25   :  { %42 = vsyncpa [#allocation3], 1 }
  0x26   :  { %43 = vsyncpa [#allocation4], 1 }

</bundles_post_ra>
